<compile_context>
chip_gen: v6e
topology: v6e:2x2x1
jax: 0.10.0
libtpu: 0.0.40
codegen_flags: <defaults>
</compile_context>

<pallas_src>
from functools import partial

import jax
import jax.numpy as jnp
from jax.experimental import pallas as pl
from jax.experimental.pallas import tpu as pltpu


def _elu(x):
    # ELU(alpha=1).  Clamp before exp so the unselected branch never produces inf.
    # (expm1 would be marginally more accurate near 0; exp is used because it is
    # guaranteed to lower on Mosaic.)
    neg = jnp.exp(jnp.minimum(x, 0.0)) - 1.0
    return jnp.where(x > 0, x, neg)


def _qvalue_kernel(x_ref, a_ref, w1x_ref, w1a_ref, b1_ref, w2t_ref, b2_ref,
                   w3t_ref, b3_ref, wo_ref, bo_ref, out_ref, *, compute_dtype):
    # ---- Layer 1 (concat-free): two MXU matmuls in natural (rows=batch) layout.
    z1 = jnp.dot(x_ref[...], w1x_ref[...], preferred_element_type=jnp.float32)
    z1 = z1 + jnp.dot(a_ref[...], w1a_ref[...], preferred_element_type=jnp.float32)

    # ---- Switch to batch-in-lanes: one XLU transpose per tile -> (H, TB).
    # Biases are (H, 1) columns: they broadcast over the lane (batch) axis.
    h = _elu((z1.T + b1_ref[...]).astype(compute_dtype))                  # (H, TB)

    # ---- Layers 2 & 3: (H, H) @ (H, TB) on the MXU, lane-dense ELU on the VPU/EUP.
    h = _elu((jnp.dot(w2t_ref[...], h, preferred_element_type=jnp.float32)
              + b2_ref[...]).astype(compute_dtype))                       # (H, TB)
    h = _elu((jnp.dot(w3t_ref[...], h, preferred_element_type=jnp.float32)
              + b3_ref[...]).astype(compute_dtype))                       # (H, TB)

    # ---- Output head: VPU multiply + sublane reduction -> lane-dense (1, TB).
    q = jnp.sum(h * wo_ref[...], axis=0, keepdims=True).astype(jnp.float32)
    q = q + bo_ref[...]                                                   # (1, TB)
    out_ref[...] = q.astype(out_ref.dtype)


def _round_up(n, m):
    return ((n + m - 1) // m) * m


def _choose_batch_tile(batch, batch_tile, min_grid_steps):
    """Pick (TB, grid) that is layout-legal and keeps the grid >= min_grid_steps.

    Multi-tile blocks need rows % 8 == 0 (sublane rule) and a lane-dense output
    tile that is a multiple of 128 (lane rule), so multi-tile TB is a multiple
    of 128.  A single tile equal to the full batch is always legal (full-dim
    escape hatch) and needs no padding at all.
    """
    batch_tile = max(128, (batch_tile // 128) * 128)
    tb = _round_up(pl.cdiv(batch, max(1, min_grid_steps)), 128)
    tb = min(tb, batch_tile)
    if tb >= batch:
        return batch, 1                      # exact full-dim tile, no ragged blocks
    return tb, pl.cdiv(batch, tb)            # ragged last block handled by Pallas


def qvalue_net_continuous(x, a, params, *, batch_tile=4096, min_grid_steps=8,
                          compute_dtype=jnp.float32):
    """Fused SAC Q-network forward.  x: (B, S), a: (B, A) -> (B, 1) float32.

    compute_dtype: jnp.float32 (default, safe everywhere / v5e) or jnp.bfloat16
    (recommended on v6e/v7x: bf16 VALU/EUP/MXU on the hidden layers).
    """
    w1, b1, w2, b2, w3, b3, wo, bo = params
    B, S = x.shape
    A = a.shape[1]
    H = w1.shape[1]

    # One-off weight prep (tiny constants; stay VMEM-resident across the grid).
    w1x = w1[:S]                                 # (S, H)  concat-free layer 1
    w1a = w1[S:]                                 # (A, H)
    b1c = b1.reshape(H, 1)                       # biases as (H, 1) columns
    w2t = w2.T.astype(compute_dtype)             # (H, H)  batch-in-lanes orientation
    b2c = b2.reshape(H, 1)
    w3t = w3.T.astype(compute_dtype)             # (H, H)
    b3c = b3.reshape(H, 1)
    wo_c = wo.reshape(H, 1).astype(compute_dtype)
    bo_c = bo.reshape(1, 1)

    TB, grid = _choose_batch_tile(B, batch_tile, min_grid_steps)
    B_out = grid * TB                            # output row is exact, never ragged

    row_block = lambda w: pl.BlockSpec((TB, w), lambda i: (i, 0))
    # Constant index_map -> fetched once, kept resident (no per-step re-DMA).
    const_block = lambda arr: pl.BlockSpec(arr.shape, lambda i: (0,) * arr.ndim)

    # Advisory cost hint for XLA's scheduler.
    flops = 2 * B_out * H * (S + A + 2 * H + 1)
    transcendentals = 3 * B_out * H                    # one exp per ELU element
    bytes_accessed = (4 * B_out * (S + A + 1)          # activations in / q out
                      + 4 * ((S + A) * H + 2 * H * H + H + 3 * H + 1))

    out = pl.pallas_call(
        partial(_qvalue_kernel, compute_dtype=compute_dtype),
        out_shape=jax.ShapeDtypeStruct((1, B_out), jnp.float32),
        grid=(grid,),
        in_specs=[row_block(S), row_block(A),
                  const_block(w1x), const_block(w1a), const_block(b1c),
                  const_block(w2t), const_block(b2c),
                  const_block(w3t), const_block(b3c),
                  const_block(wo_c), const_block(bo_c)],
        out_specs=pl.BlockSpec((1, TB), lambda i: (0, i)),
        compiler_params=pltpu.CompilerParams(
            dimension_semantics=("parallel",),
            vmem_limit_bytes=32 * 1024 * 1024),
        cost_estimate=pl.CostEstimate(
            flops=flops,
            transcendentals=transcendentals,
            bytes_accessed=bytes_accessed),
    )(x, a, w1x, w1a, b1c, w2t, b2c, w3t, b3c, wo_c, bo_c)

    return out[0, :B].reshape(B, 1)


def init_params(key, state_dim, hidden_dim, action_dim):
    """torch.nn.Linear-style U(-1/sqrt(fan_in), 1/sqrt(fan_in)) init.

    Weights stored as (in_features, out_features), i.e. transposed vs. PyTorch's
    (out, in), so the reference forward is a plain `x @ W + b`.
    """
    dims = [(state_dim + action_dim, hidden_dim),
            (hidden_dim, hidden_dim),
            (hidden_dim, hidden_dim),
            (hidden_dim, 1)]
    params = []
    for (fan_in, fan_out) in dims:
        key, kw, kb = jax.random.split(key, 3)
        bound = 1.0 / jnp.sqrt(fan_in)
        w = jax.random.uniform(kw, (fan_in, fan_out), jnp.float32, -bound, bound)
        b = jax.random.uniform(kb, (1, fan_out), jnp.float32, -bound, bound)
        params.extend([w, b])
    return tuple(params)


def _reference(x, a, params):
    w1, b1, w2, b2, w3, b3, wo, bo = params
    h = jnp.concatenate([x, a], axis=1)
    h = jax.nn.elu(h @ w1 + b1)
    h = jax.nn.elu(h @ w2 + b2)
    h = jax.nn.elu(h @ w3 + b3)
    return h @ wo + bo


if __name__ == "__main__":
    state_dim, hidden_dim, action_dim = 16, 32, 4

    key = jax.random.PRNGKey(0)
    kx, ka, kp = jax.random.split(key, 3)
    params = init_params(kp, state_dim, hidden_dim, action_dim)

    # 1) Small batch -> single exact full-dim tile (grid = 1), f32 everywhere.
    batch = 8
    x1 = jax.random.normal(kx, (batch, state_dim), jnp.float32)
    a1 = jax.random.normal(ka, (batch, action_dim), jnp.float32)
    q1 = jax.block_until_ready(qvalue_net_continuous(x1, a1, params))
    q1_ref = _reference(x1, a1, params)
    assert q1.shape == (batch, 1)
    assert jnp.allclose(q1, q1_ref, atol=1e-5, rtol=1e-5), (q1, q1_ref)

    # 2) Multi-tile grid with a ragged last block (no padding copies anywhere).
    batch2 = 300
    kx2, ka2 = jax.random.split(jax.random.PRNGKey(1))
    x2 = jax.random.normal(kx2, (batch2, state_dim), jnp.float32)
    a2 = jax.random.normal(ka2, (batch2, action_dim), jnp.float32)
    q2 = jax.block_until_ready(
        qvalue_net_continuous(x2, a2, params, batch_tile=128, min_grid_steps=4))
    q2_ref = _reference(x2, a2, params)
    assert q2.shape == (batch2, 1)
    assert jnp.allclose(q2, q2_ref, atol=1e-5, rtol=1e-5), (q2, q2_ref)

    # 3) bf16 hidden-layer path (recommended on v6e/v7x), looser tolerance.
    q3 = jax.block_until_ready(
        qvalue_net_continuous(x2, a2, params, batch_tile=128, min_grid_steps=4,
                              compute_dtype=jnp.bfloat16))
    assert q3.shape == (batch2, 1)
    assert jnp.allclose(q3, q2_ref, atol=5e-2, rtol=5e-2), (q3, q2_ref)

    print("KERNEL_OK")
</pallas_src>

<mosaic_0001>
module attributes {stable_mosaic.version = 11 : i64} {
  func.func @_qvalue_kernel(%arg0: i32, %arg1: memref<8x16xf32, #tpu.memory_space<vmem>>, %arg2: memref<8x4xf32, #tpu.memory_space<vmem>>, %arg3: memref<16x32xf32, #tpu.memory_space<vmem>>, %arg4: memref<4x32xf32, #tpu.memory_space<vmem>>, %arg5: memref<32x1xf32, #tpu.memory_space<vmem>>, %arg6: memref<32x32xf32, #tpu.memory_space<vmem>>, %arg7: memref<32x1xf32, #tpu.memory_space<vmem>>, %arg8: memref<32x32xf32, #tpu.memory_space<vmem>>, %arg9: memref<32x1xf32, #tpu.memory_space<vmem>>, %arg10: memref<32x1xf32, #tpu.memory_space<vmem>>, %arg11: memref<1x1xf32, #tpu.memory_space<vmem>>, %arg12: memref<1x8xf32, #tpu.memory_space<vmem>>) attributes {dimension_semantics = [#tpu.dimension_semantics<parallel>], iteration_bounds = array<i64: 1>, scalar_prefetch = 0 : i64, scratch_operands = 0 : i64, tpu.core_type = #tpu.core_type<tc>, window_params = [{transform_indices = @transform_0, window_bounds = array<i64: 8, 16>}, {transform_indices = @transform_1, window_bounds = array<i64: 8, 4>}, {pipeline_mode = #tpu.pipeline_mode<synchronous>, transform_indices = @transform_2, window_bounds = array<i64: 16, 32>}, {pipeline_mode = #tpu.pipeline_mode<synchronous>, transform_indices = @transform_3, window_bounds = array<i64: 4, 32>}, {pipeline_mode = #tpu.pipeline_mode<synchronous>, transform_indices = @transform_4, window_bounds = array<i64: 32, 1>}, {pipeline_mode = #tpu.pipeline_mode<synchronous>, transform_indices = @transform_5, window_bounds = array<i64: 32, 32>}, {pipeline_mode = #tpu.pipeline_mode<synchronous>, transform_indices = @transform_6, window_bounds = array<i64: 32, 1>}, {pipeline_mode = #tpu.pipeline_mode<synchronous>, transform_indices = @transform_7, window_bounds = array<i64: 32, 32>}, {pipeline_mode = #tpu.pipeline_mode<synchronous>, transform_indices = @transform_8, window_bounds = array<i64: 32, 1>}, {pipeline_mode = #tpu.pipeline_mode<synchronous>, transform_indices = @transform_9, window_bounds = array<i64: 32, 1>}, {pipeline_mode = #tpu.pipeline_mode<synchronous>, transform_indices = @transform_10, window_bounds = array<i64: 1, 1>}, {transform_indices = @transform_11, window_bounds = array<i64: 1, 8>}]} {
    %c0 = arith.constant 0 : index
    %c0_0 = arith.constant 0 : index
    %0 = vector.load %arg1[%c0, %c0_0] : memref<8x16xf32, #tpu.memory_space<vmem>>, vector<8x16xf32>
    %c0_1 = arith.constant 0 : index
    %c0_2 = arith.constant 0 : index
    %1 = vector.load %arg3[%c0_1, %c0_2] : memref<16x32xf32, #tpu.memory_space<vmem>>, vector<16x32xf32>
    %cst = arith.constant dense<0.000000e+00> : vector<8x32xf32>
    %2 = tpu.matmul %0, %1, %cst {dimension_numbers = #tpu.dot_dimension_numbers<[1], [0], [0], [1], [0, 0, 1, 1], [], []>} : vector<8x16xf32>, vector<16x32xf32>, vector<8x32xf32> -> vector<8x32xf32>
    %c0_3 = arith.constant 0 : index
    %c0_4 = arith.constant 0 : index
    %3 = vector.load %arg2[%c0_3, %c0_4] : memref<8x4xf32, #tpu.memory_space<vmem>>, vector<8x4xf32>
    %c0_5 = arith.constant 0 : index
    %c0_6 = arith.constant 0 : index
    %4 = vector.load %arg4[%c0_5, %c0_6] : memref<4x32xf32, #tpu.memory_space<vmem>>, vector<4x32xf32>
    %cst_7 = arith.constant dense<0.000000e+00> : vector<8x32xf32>
    %5 = tpu.matmul %3, %4, %cst_7 {dimension_numbers = #tpu.dot_dimension_numbers<[1], [0], [0], [1], [0, 0, 1, 1], [], []>} : vector<8x4xf32>, vector<4x32xf32>, vector<8x32xf32> -> vector<8x32xf32>
    %6 = arith.addf %2, %5 : vector<8x32xf32>
    %7 = tpu.transpose %6, [1, 0] : vector<8x32xf32> -> vector<32x8xf32>
    %c0_8 = arith.constant 0 : index
    %c0_9 = arith.constant 0 : index
    %8 = vector.load %arg5[%c0_8, %c0_9] : memref<32x1xf32, #tpu.memory_space<vmem>>, vector<32x1xf32>
    %9 = vector.broadcast %8 : vector<32x1xf32> to vector<32x8xf32>
    %10 = arith.addf %7, %9 : vector<32x8xf32>
    %cst_10 = arith.constant 0.000000e+00 : f32
    %11 = vector.broadcast %cst_10 : f32 to vector<32x8xf32>
    %12 = arith.minimumf %10, %11 : vector<32x8xf32>
    %13 = math.exp %12 : vector<32x8xf32>
    %cst_11 = arith.constant 1.000000e+00 : f32
    %14 = vector.broadcast %cst_11 : f32 to vector<32x8xf32>
    %15 = arith.subf %13, %14 : vector<32x8xf32>
    %cst_12 = arith.constant 0.000000e+00 : f32
    %16 = vector.broadcast %cst_12 : f32 to vector<32x8xf32>
    %17 = arith.cmpf ogt, %10, %16 : vector<32x8xf32>
    %18 = arith.select %17, %10, %15 : vector<32x8xi1>, vector<32x8xf32>
    %c0_13 = arith.constant 0 : index
    %c0_14 = arith.constant 0 : index
    %19 = vector.load %arg6[%c0_13, %c0_14] : memref<32x32xf32, #tpu.memory_space<vmem>>, vector<32x32xf32>
    %cst_15 = arith.constant dense<0.000000e+00> : vector<32x8xf32>
    %20 = tpu.matmul %19, %18, %cst_15 {dimension_numbers = #tpu.dot_dimension_numbers<[1], [0], [0], [1], [0, 0, 1, 1], [], []>} : vector<32x32xf32>, vector<32x8xf32>, vector<32x8xf32> -> vector<32x8xf32>
    %c0_16 = arith.constant 0 : index
    %c0_17 = arith.constant 0 : index
    %21 = vector.load %arg7[%c0_16, %c0_17] : memref<32x1xf32, #tpu.memory_space<vmem>>, vector<32x1xf32>
    %22 = vector.broadcast %21 : vector<32x1xf32> to vector<32x8xf32>
    %23 = arith.addf %20, %22 : vector<32x8xf32>
    %cst_18 = arith.constant 0.000000e+00 : f32
    %24 = vector.broadcast %cst_18 : f32 to vector<32x8xf32>
    %25 = arith.minimumf %23, %24 : vector<32x8xf32>
    %26 = math.exp %25 : vector<32x8xf32>
    %cst_19 = arith.constant 1.000000e+00 : f32
    %27 = vector.broadcast %cst_19 : f32 to vector<32x8xf32>
    %28 = arith.subf %26, %27 : vector<32x8xf32>
    %cst_20 = arith.constant 0.000000e+00 : f32
    %29 = vector.broadcast %cst_20 : f32 to vector<32x8xf32>
    %30 = arith.cmpf ogt, %23, %29 : vector<32x8xf32>
    %31 = arith.select %30, %23, %28 : vector<32x8xi1>, vector<32x8xf32>
    %c0_21 = arith.constant 0 : index
    %c0_22 = arith.constant 0 : index
    %32 = vector.load %arg8[%c0_21, %c0_22] : memref<32x32xf32, #tpu.memory_space<vmem>>, vector<32x32xf32>
    %cst_23 = arith.constant dense<0.000000e+00> : vector<32x8xf32>
    %33 = tpu.matmul %32, %31, %cst_23 {dimension_numbers = #tpu.dot_dimension_numbers<[1], [0], [0], [1], [0, 0, 1, 1], [], []>} : vector<32x32xf32>, vector<32x8xf32>, vector<32x8xf32> -> vector<32x8xf32>
    %c0_24 = arith.constant 0 : index
    %c0_25 = arith.constant 0 : index
    %34 = vector.load %arg9[%c0_24, %c0_25] : memref<32x1xf32, #tpu.memory_space<vmem>>, vector<32x1xf32>
    %35 = vector.broadcast %34 : vector<32x1xf32> to vector<32x8xf32>
    %36 = arith.addf %33, %35 : vector<32x8xf32>
    %cst_26 = arith.constant 0.000000e+00 : f32
    %37 = vector.broadcast %cst_26 : f32 to vector<32x8xf32>
    %38 = arith.minimumf %36, %37 : vector<32x8xf32>
    %39 = math.exp %38 : vector<32x8xf32>
    %cst_27 = arith.constant 1.000000e+00 : f32
    %40 = vector.broadcast %cst_27 : f32 to vector<32x8xf32>
    %41 = arith.subf %39, %40 : vector<32x8xf32>
    %cst_28 = arith.constant 0.000000e+00 : f32
    %42 = vector.broadcast %cst_28 : f32 to vector<32x8xf32>
    %43 = arith.cmpf ogt, %36, %42 : vector<32x8xf32>
    %44 = arith.select %43, %36, %41 : vector<32x8xi1>, vector<32x8xf32>
    %c0_29 = arith.constant 0 : index
    %c0_30 = arith.constant 0 : index
    %45 = vector.load %arg10[%c0_29, %c0_30] : memref<32x1xf32, #tpu.memory_space<vmem>>, vector<32x1xf32>
    %46 = vector.broadcast %45 : vector<32x1xf32> to vector<32x8xf32>
    %47 = arith.mulf %44, %46 : vector<32x8xf32>
    %cst_31 = arith.constant dense<0.000000e+00> : vector<8xf32>
    %48 = vector.multi_reduction <add>, %47, %cst_31 [0] : vector<32x8xf32> to vector<8xf32>
    %49 = vector.shape_cast %48 : vector<8xf32> to vector<1x8xf32>
    %c0_32 = arith.constant 0 : index
    %c0_33 = arith.constant 0 : index
    %50 = vector.load %arg11[%c0_32, %c0_33] : memref<1x1xf32, #tpu.memory_space<vmem>>, vector<1x1xf32>
    %51 = vector.broadcast %50 : vector<1x1xf32> to vector<1x8xf32>
    %52 = arith.addf %49, %51 : vector<1x8xf32>
    %c0_34 = arith.constant 0 : index
    %c0_35 = arith.constant 0 : index
    %53 = vector.load %arg12[%c0_34, %c0_35] : memref<1x8xf32, #tpu.memory_space<vmem>>, vector<1x8xf32>
    tpu.vector_store %arg12[%c0_34, %c0_35], %52 {strides = array<i32>} : memref<1x8xf32, #tpu.memory_space<vmem>>, vector<1x8xf32>,
    return
  }
  func.func @transform_0(%arg0: i32) -> (i32, i32) {
    %c0_i32 = arith.constant 0 : i32
    %c0_i32_0 = arith.constant 0 : i32
    return %arg0, %c0_i32 : i32, i32
  }
  func.func @transform_1(%arg0: i32) -> (i32, i32) {
    %c0_i32 = arith.constant 0 : i32
    %c0_i32_0 = arith.constant 0 : i32
    return %arg0, %c0_i32 : i32, i32
  }
  func.func @transform_2(%arg0: i32) -> (i32, i32) {
    %c0_i32 = arith.constant 0 : i32
    %c0_i32_0 = arith.constant 0 : i32
    %c0_i32_1 = arith.constant 0 : i32
    return %c0_i32, %c0_i32_0 : i32, i32
  }
  func.func @transform_3(%arg0: i32) -> (i32, i32) {
    %c0_i32 = arith.constant 0 : i32
    %c0_i32_0 = arith.constant 0 : i32
    %c0_i32_1 = arith.constant 0 : i32
    return %c0_i32, %c0_i32_0 : i32, i32
  }
  func.func @transform_4(%arg0: i32) -> (i32, i32) {
    %c0_i32 = arith.constant 0 : i32
    %c0_i32_0 = arith.constant 0 : i32
    %c0_i32_1 = arith.constant 0 : i32
    return %c0_i32, %c0_i32_0 : i32, i32
  }
  func.func @transform_5(%arg0: i32) -> (i32, i32) {
    %c0_i32 = arith.constant 0 : i32
    %c0_i32_0 = arith.constant 0 : i32
    %c0_i32_1 = arith.constant 0 : i32
    return %c0_i32, %c0_i32_0 : i32, i32
  }
  func.func @transform_6(%arg0: i32) -> (i32, i32) {
    %c0_i32 = arith.constant 0 : i32
    %c0_i32_0 = arith.constant 0 : i32
    %c0_i32_1 = arith.constant 0 : i32
    return %c0_i32, %c0_i32_0 : i32, i32
  }
  func.func @transform_7(%arg0: i32) -> (i32, i32) {
    %c0_i32 = arith.constant 0 : i32
    %c0_i32_0 = arith.constant 0 : i32
    %c0_i32_1 = arith.constant 0 : i32
    return %c0_i32, %c0_i32_0 : i32, i32
  }
  func.func @transform_8(%arg0: i32) -> (i32, i32) {
    %c0_i32 = arith.constant 0 : i32
    %c0_i32_0 = arith.constant 0 : i32
    %c0_i32_1 = arith.constant 0 : i32
    return %c0_i32, %c0_i32_0 : i32, i32
  }
  func.func @transform_9(%arg0: i32) -> (i32, i32) {
    %c0_i32 = arith.constant 0 : i32
    %c0_i32_0 = arith.constant 0 : i32
    %c0_i32_1 = arith.constant 0 : i32
    return %c0_i32, %c0_i32_0 : i32, i32
  }
  func.func @transform_10(%arg0: i32) -> (i32, i32) {
    %c0_i32 = arith.constant 0 : i32
    %c0_i32_0 = arith.constant 0 : i32
    %c0_i32_1 = arith.constant 0 : i32
    return %c0_i32, %c0_i32_0 : i32, i32
  }
  func.func @transform_11(%arg0: i32) -> (i32, i32) {
    %c0_i32 = arith.constant 0 : i32
    %c0_i32_0 = arith.constant 0 : i32
    return %c0_i32, %arg0 : i32, i32
  }
}

</mosaic_0001>

<bundles_post_ra>
// kernel: tpu_custom_call.1
= control target key start
LH: loop header
LB: loop body
LE: loop exit
PB: predicated region body
PF: predicated region fallthrough
CT: control target
= control target key end

     0   :  { %s951_s0 = inlined_call_operand.vmem [shape: f32[8,16], index: 0, kind: input, shape index: {}]   ;;  %s952_s1 = inlined_call_operand.vmem [shape: f32[8,4], index: 1, kind: input, shape index: {}]   ;;  %s953_s2 = inlined_call_operand.vmem [shape: f32[16,32], index: 2, kind: input, shape index: {}]   ;;  %s954_s3 = inlined_call_operand.vmem [shape: f32[4,32], index: 3, kind: input, shape index: {}]   ;;  %s955_s4 = inlined_call_operand.vmem [shape: f32[32,1], index: 4, kind: input, shape index: {}]   ;;  %s956_s5 = inlined_call_operand.vmem [shape: f32[32,32], index: 5, kind: input, shape index: {}]   ;;  %s957_s6 = inlined_call_operand.vmem [shape: f32[32,1], index: 6, kind: input, shape index: {}]   ;;  %s958_s7 = inlined_call_operand.vmem [shape: f32[32,32], index: 7, kind: input, shape index: {}]   ;;  %s959_s8 = inlined_call_operand.vmem [shape: f32[32,1], index: 8, kind: input, shape index: {}]   ;;  %s960_s9 = inlined_call_operand.vmem [shape: f32[32,1], index: 9, kind: input, shape index: {}]   ;;  %s961_s10 = inlined_call_operand.<no memory space> [shape: f32[1,1], index: 10, kind: input, shape index: {}]   ;;  %s962_s11 = inlined_call_operand.hbm [shape: f32[1,8], index: 11, kind: output, shape index: {}]  }
   0x1   :  { %v16_v0 = vstv %s961_s10 }
   0x2   :  { %17 = vst [vmem:[#allocation2] sm:$0x1] %v16_v0 }
   0x3   :  { %v45_v1 = vld [vmem:[%s954_s3] sm:$0xf]  ;;  %vm50_vm0 = vcmask 1043456   ;;  %v43_v2 = vld [vmem:[%s953_s2 + $0x8] sm:$0xff]  ;;  %v786_v3 = vmov 0.0   ;;  %vm46_vm1 = vcmask 31744  }
   0x4   :  { %694 = vmatprep.subr.mxu0 %v786_v3  ;;  %699 = vmatprep.subr.mxu1 %v786_v3  ;;  %v44_v4 = vld [vmem:[%s952_s1] sm:$0xff]  ;;  %vm787_vm2 = vmmov 0   ;;  %vm124_vm3 = vcmask 130048   ;;  %v233_v7 = vld [vmem:[%s955_s4 + $0x18] sm:$0xff]  ;;  %v231_v8 = vld [vmem:[%s955_s4 + $0x8] sm:$0xff]  ;;  %v788_v9 = vmov 0  }
   0x5   :  { %695 = vmatpush3.msk.msra.mxu0 %vm50_vm0, %v45_v1  ;;  %696 = vmatprep.mubr.msk.f32.mxu0 %vm787_vm2, %v786_v3  ;;  %v42_v5 = vld [vmem:[%s953_s2] sm:$0xff] }
   0x6   :  { %700 = vmatpush3.msra.mxu1 %v43_v2  ;;  %697 = vmatmul.mubr.msk.f32.vlgmr.msra.gmra.mxu0 %vm46_vm1, %v44_v4  ;;  %v41_v6 = vld [vmem:[%s951_s0] sm:$0xff] }
   0x7   :  { %701 = vmatprep.subr.mxu1 %v786_v3  ;;  %703 = vmatprep.mubr.msk.f32.mxu1 %vm787_vm2, %v786_v3 }
   0x8   :  { %702 = vmatpush3.msra.mxu1 %v42_v5  ;;  %738 = vset.pattern.permute.xlu0 %v788_v9 }
   0x9   :  { %18 = vsyncpa [#allocation4], 0  ;;  %704 = vmatmul.mubr.msk.f32.vlgmr.msra.gmra.mxu1 %vm124_vm3, %v41_v6  ;;  %739 = vset.pattern.permute.xlu1 %v788_v9  ;;  %v232_v10 = vld [vmem:[%s955_s4 + $0x10] sm:$0xff]  ;;  %v230_v11 = vld [vmem:[%s955_s4] sm:$0xff]  ;;  %vm310_vm4 = vcmask 261120   ;;  %vm609_vm0 = vcmask 64512  }
   0xa   :  { %251 = vperm.xlu0 %738, %v233_v7   ;;  %241 = vperm.xlu1 %739, %v231_v8   ;;  %v289_v12 = vld [vmem:[%s957_s6 + $0x18] sm:$0xff]  ;;  %v288_v13 = vld [vmem:[%s957_s6 + $0x10] sm:$0xff]  ;;  %v287_v14 = vld [vmem:[%s957_s6 + $0x8] sm:$0xff]  ;;  %vm634_vm2 = vcmask 57344  }
   0xb   :  { %v286_v15 = vld [vmem:[%s957_s6] sm:$0xff]  ;;  %v437_v17 = vld [vmem:[%s959_s8 + $0x8] sm:$0xff]  ;;  %v438_v18 = vld [vmem:[%s959_s8 + $0x10] sm:$0xff] }
   0xc   :  { %v436_v16 = vld [vmem:[%s959_s8] sm:$0xff]  ;;  %v439_v19 = vld [vmem:[%s959_s8 + $0x18] sm:$0xff]  ;;  %v582_v20 = vld [vmem:[%s960_s9 + $0x8] sm:$0xff] }
   0xd   :  { %v583_v21 = vld [vmem:[%s960_s9 + $0x10] sm:$0xff]  ;;  %v584_v22 = vld [vmem:[%s960_s9 + $0x18] sm:$0xff]  ;;  %v623_v23 = vld [vmem:[#allocation2] sm:$0x1] }
   0xe   :  { %246 = vperm.xlu0 %738, %v232_v10   ;;  %236 = vperm.xlu1 %739, %v230_v11   ;;  %v282_v29 = vld [vmem:[%s956_s5] sm:$0xff]  ;;  %v283_v63 = vld [vmem:[%s956_s5 + $0x8] sm:$0xff]  ;;  %v284_v0 = vld [vmem:[%s956_s5 + $0x10] sm:$0xff] }
   0xf   :  { %714 = vmatprep.mubr.msk.f32.mxu0 %vm310_vm4, %v282_v29  ;;  %v581_v30 = vld [vmem:[%s960_s9] sm:$0xff]  ;;  %v285_v1 = vld [vmem:[%s956_s5 + $0x18] sm:$0xff] }
  0x10   :  { %v432_v2 = vld [vmem:[%s958_s7] sm:$0xff] }
  0x11   :  { %728 = vmatprep.mubr.msk.f32.mxu1 %vm310_vm4, %v432_v2 }
  0x12   :  { %307 = vperm.xlu1 %739, %v289_v12  }
  0x16   :  { %302 = vperm.xlu1 %739, %v288_v13  }
  0x1a   :  { %297 = vperm.xlu1 %739, %v287_v14  }
  0x1e   :  { %292 = vperm.xlu1 %739, %v286_v15  }
  0x22   :  { %442 = vperm.xlu1 %739, %v436_v16  }
  0x26   :  { %447 = vperm.xlu1 %739, %v437_v17  }
  0x2a   :  { %452 = vperm.xlu1 %739, %v438_v18  }
  0x2e   :  { %457 = vperm.xlu1 %739, %v439_v19  }
  0x32   :  { %592 = vperm.xlu1 %739, %v582_v20  }
  0x36   :  { %597 = vperm.xlu1 %739, %v583_v21  }
  0x3a   :  { %602 = vperm.xlu1 %739, %v584_v22  }
  0x3e   :  { %626 = vperm.xlu1 %739, %v623_v23  }
  0x85   :  { %v252_v31 = vpop.permute.xlu0 %251  ;;  %v242_v34 = vpop.permute.xlu1 %241 }
  0x89   :  { %v247_v32 = vpop.permute.xlu0 %246  ;;  %v237_v37 = vpop.permute.xlu1 %236 }
  0x8d   :  { %v308_v3 = vpop.permute.xlu1 %307 }
  0x91   :  { %v303_v4 = vpop.permute.xlu1 %302 }
  0x95   :  { %v298_v5 = vpop.permute.xlu1 %297 }
  0x99   :  { %v293_v8 = vpop.permute.xlu1 %292 }
  0xc6   :  { %v120_v24 = vpop.f32.mrf.mxu0 }
  0xc8   :  { %v698_v25 = vpop.f32.mrf.mxu0 }
  0xc9   :  { %v194_v26 = vpop.f32.mrf.mxu1 }
  0xca   :  { %v195_v27 = vadd.f32 %v194_v26, %v120_v24 }
  0xcb   :  { %v705_v28 = vpop.f32.mrf.mxu1 }
  0xcc   :  { %198 = vxpose.xlu0.b32.start.end [1/1] (short) (narrow) %v195_v27, 32 }
 0x101   :  { %587 = vperm.xlu0 %738, %v581_v30  }
 0x148   :  { %v214_v33 = vpop.trf.xlu0 }
 0x149   :  { %v254_v39 = vadd.f32 %v237_v37, %v214_v33  ;;  %v435_v37 = vld [vmem:[%s958_s7 + $0x18] sm:$0xff] }
 0x14b   :  { %v258_v44 = vmin.f32 %v254_v39, 0.0  ;;  %vm274_vm8 = vcmp.gt.f32.partialorder %v254_v39, 0.0 }
 0x14c   :  { %v215_v35 = vpop.trf.xlu0 }
 0x14d   :  { %v255_v36 = vadd.f32 %v242_v34, %v215_v35  ;;  %v262_v49 = vmul.f32 1.442695, %v258_v44  ;;  %v433_v35 = vld [vmem:[%s958_s7 + $0x8] sm:$0xff] }
 0x14f   :  { %v259_v41 = vmin.f32 %v255_v36, 0.0  ;;  %vm275_vm7 = vcmp.gt.f32.partialorder %v255_v36, 0.0 }
 0x150   :  { %v216_v38 = vpop.trf.xlu0 }
 0x151   :  { %v256_v40 = vadd.f32 %v247_v32, %v216_v38  ;;  %v264_v47 = vmul.f32 1.442695, %v259_v41  ;;  %v443_v38 = vpop.permute.xlu1 %442 }
 0x153   :  { %v260_v42 = vmin.f32 %v256_v40, 0.0  ;;  %vm276_vm6 = vcmp.gt.f32.partialorder %v256_v40, 0.0 }
 0x154   :  { %v217_v43 = vpop.trf.xlu0 }
 0x155   :  { %v266_v45 = vmul.f32 1.442695, %v260_v42  ;;  %v257_v46 = vadd.f32 %v252_v31, %v217_v43 }
 0x157   :  { %v261_v48 = vmin.f32 %v257_v46, 0.0  ;;  %740 = vpow2.f32 %v266_v45  ;;  %vm277_vm5 = vcmp.gt.f32.partialorder %v257_v46, 0.0 }
 0x158   :  { %742 = vpow2.f32 %v264_v47 }
 0x159   :  { %v268_v50 = vmul.f32 1.442695, %v261_v48 }
 0x15b   :  { %744 = vpow2.f32 %v268_v50 }
 0x15c   :  { %746 = vpow2.f32 %v262_v49 }
 0x164   :  { %v741_v51 = vpop.eup %740 }
 0x165   :  { %v743_v52 = vpop.eup %742  ;;  %v655_v55 = vadd.f32 -1.0, %v741_v51 }
 0x166   :  { %v654_v58 = vadd.f32 -1.0, %v743_v52 }
 0x167   :  { %v280_v59 = vsel %vm276_vm6, %v256_v40, %v655_v55 }
 0x168   :  { %v745_v53 = vpop.eup %744  ;;  %v279_v61 = vsel %vm275_vm7, %v255_v36, %v654_v58  ;;  %v434_v36 = vld [vmem:[%s958_s7 + $0x10] sm:$0xff]  ;;  %s789_s7 = smov [#allocation3]  }
 0x169   :  { %v656_v54 = vadd.f32 -1.0, %v745_v53  ;;  %v747_v56 = vpop.eup %746  ;;  %s642_s23 = sshll.u32 %s789_s7, 4  ;;  %s643_s23 = int_to_ptr.vmem [resolvable:$true] %s642_s23 }
 0x16a   :  { %v653_v60 = vadd.f32 -1.0, %v747_v56  ;;  %s764_s24 = scalar_lea.vmem %s643_s23, 16  ;;  %s768_s10 = scalar_lea.vmem %s643_s23, 32 }
 0x16b   :  { %v281_v57 = vsel %vm277_vm5, %v257_v46, %v656_v54  ;;  %p765_p0 = scmp.ne.s32.totalorder %s643_s23, %s764_s24  ;;  %p769_p1 = scmp.lt.s32.totalorder %s643_s23, %s643_s23 }
 0x16c   :  { %706 = vmatprep.subr.mxu0 %v281_v57  ;;  %v278_v62 = vsel %vm274_vm8, %v254_v39, %v653_v60  ;;  %v448_v39 = vpop.permute.xlu1 %447  ;;  %p770_p2 = scmp.lt.s32.totalorder %s768_s10, %s764_s24 }
 0x16d   :  { %707 = vmatpush3.msra.mxu0 %v281_v57 }
 0x16e   :  { %708 = vmatprep.subr.mxu0 %v280_v59  ;;  %p771_p3 = por %p770_p2, %p769_p1 }
 0x16f   :  { %709 = vmatpush3.msra.mxu0 %v280_v59 }
 0x170   :  { %710 = vmatprep.subr.mxu0 %v279_v61  ;;  %v453_v40 = vpop.permute.xlu1 %452  ;;  %p772_p4 = pnand %p771_p3, %p765_p0 }
 0x171   :  { %711 = vmatpush3.msra.mxu0 %v279_v61 }
 0x172   :  { %712 = vmatprep.subr.mxu0 %v278_v62 }
 0x173   :  { %713 = vmatpush3.msra.mxu0 %v278_v62 }
 0x174   :  { %715 = vmatmul.mubr.msk.f32.vlgmr.msra.gmra.mxu0 %vm310_vm4, %v283_v63  ;;  %v458_v46 = vpop.permute.xlu1 %457 }
 0x175   :  { %717 = vmatprep.mubr.msk.f32.mxu0 %vm310_vm4, %v284_v0 }
 0x178   :  { %718 = vmatmul.mubr.msk.f32.gmra.mxu0 %vm310_vm4, %v285_v1  ;;  %v593_v58 = vpop.permute.xlu1 %592 }
 0x17c   :  { %v598_v0 = vpop.permute.xlu1 %597  ;;  %v588_v2 = vpop.permute.xlu0 %587 }
 0x234   :  { %v716_v6 = vpop.f32.mrf.mxu0 }
 0x235   :  { %v395_v7 = vadd.f32 %v716_v6, %v298_v5 }
 0x236   :  { %v389_v9 = vpop.f32.mrf.mxu0 }
 0x237   :  { %v409_v10 = vmin.f32 %v395_v7, 0.0  ;;  %v390_v11 = vadd.f32 %v389_v9, %v293_v8  ;;  %vm425_vm11 = vcmp.gt.f32.partialorder %v395_v7, 0.0 }
 0x238   :  { %v719_v12 = vpop.f32.mrf.mxu0 }
 0x239   :  { %v408_v13 = vmin.f32 %v390_v11, 0.0  ;;  %v405_v14 = vadd.f32 %v719_v12, %v308_v3  ;;  %v414_v15 = vmul.f32 1.442695, %v409_v10  ;;  %vm424_vm12 = vcmp.gt.f32.partialorder %v390_v11, 0.0 }
 0x23a   :  { %v399_v16 = vpop.f32.mrf.mxu0 }
 0x23b   :  { %v411_v17 = vmin.f32 %v405_v14, 0.0  ;;  %v400_v18 = vadd.f32 %v399_v16, %v303_v4  ;;  %v412_v19 = vmul.f32 1.442695, %v408_v13  ;;  %748 = vpow2.f32 %v414_v15 }
 0x23c   :  { %vm427_vm9 = vcmp.gt.f32.partialorder %v405_v14, 0.0 }
 0x23d   :  { %v418_v20 = vmul.f32 1.442695, %v411_v17  ;;  %v410_v21 = vmin.f32 %v400_v18, 0.0  ;;  %vm426_vm10 = vcmp.gt.f32.partialorder %v400_v18, 0.0 }
 0x23f   :  { %750 = vpow2.f32 %v418_v20  ;;  %v416_v22 = vmul.f32 1.442695, %v410_v21  ;;  %v629_v20 = vlaneseq }
 0x240   :  { %752 = vpow2.f32 %v412_v19 }
 0x241   :  { %754 = vpow2.f32 %v416_v22 }
 0x248   :  { %v749_v23 = vpop.eup %748 }
 0x249   :  { %v662_v30 = vadd.f32 -1.0, %v749_v23  ;;  %v630_v23 = vshrl.u32 %v629_v20, 7 }
 0x24b   :  { %v429_v33 = vsel %vm425_vm11, %v395_v7, %v662_v30 }
 0x24c   :  { %v751_v24 = vpop.eup %750 }
 0x24d   :  { %v753_v25 = vpop.eup %752  ;;  %v664_v26 = vadd.f32 -1.0, %v751_v24 }
 0x24e   :  { %v755_v27 = vpop.eup %754  ;;  %v661_v32 = vadd.f32 -1.0, %v753_v25 }
 0x24f   :  { %v431_v28 = vsel %vm427_vm9, %v405_v14, %v664_v26  ;;  %v663_v29 = vadd.f32 -1.0, %v755_v27  ;;  %v631_v26 = vsub.s32 0, %v630_v23 }
 0x250   :  { %720 = vmatprep.subr.mxu1 %v431_v28  ;;  %v428_v34 = vsel %vm424_vm12, %v390_v11, %v661_v32  ;;  %v603_v11 = vpop.permute.xlu1 %602 }
 0x251   :  { %721 = vmatpush3.msra.mxu1 %v431_v28  ;;  %v430_v31 = vsel %vm426_vm10, %v400_v18, %v663_v29 }
 0x252   :  { %722 = vmatprep.subr.mxu1 %v430_v31 }
 0x253   :  { %723 = vmatpush3.msra.mxu1 %v430_v31 }
 0x254   :  { %724 = vmatprep.subr.mxu1 %v429_v33  ;;  %v627_v28 = vpop.permute.xlu1 %626 }
 0x255   :  { %725 = vmatpush3.msra.mxu1 %v429_v33  ;;  %v632_v30 = vrot.slane %v627_v28, %v631_v26 }
 0x256   :  { %726 = vmatprep.subr.mxu1 %v428_v34 }
 0x257   :  { %727 = vmatpush3.msra.mxu1 %v428_v34 }
 0x258   :  { %729 = vmatmul.mubr.msk.f32.vlgmr.msra.gmra.mxu1 %vm310_vm4, %v433_v35 }
 0x259   :  { %731 = vmatprep.mubr.msk.f32.mxu1 %vm310_vm4, %v434_v36 }
 0x25c   :  { %732 = vmatmul.mubr.msk.f32.gmra.mxu1 %vm310_vm4, %v435_v37 }
 0x318   :  { %v730_v41 = vpop.f32.mrf.mxu1 }
 0x319   :  { %v544_v42 = vadd.f32 %v730_v41, %v448_v39 }
 0x31a   :  { %v538_v43 = vpop.f32.mrf.mxu1 }
 0x31b   :  { %v558_v44 = vmin.f32 %v544_v42, 0.0  ;;  %v539_v45 = vadd.f32 %v538_v43, %v443_v38  ;;  %vm574_vm13 = vcmp.gt.f32.partialorder %v544_v42, 0.0 }
 0x31c   :  { %v733_v47 = vpop.f32.mrf.mxu1 }
 0x31d   :  { %v563_v48 = vmul.f32 1.442695, %v558_v44  ;;  %v557_v49 = vmin.f32 %v539_v45, 0.0  ;;  %v554_v50 = vadd.f32 %v733_v47, %v458_v46  ;;  %vm573_vm14 = vcmp.gt.f32.partialorder %v539_v45, 0.0 }
 0x31e   :  { %v548_v51 = vpop.f32.mrf.mxu1 }
 0x31f   :  { %756 = vpow2.f32 %v563_v48  ;;  %v561_v52 = vmul.f32 1.442695, %v557_v49  ;;  %v560_v53 = vmin.f32 %v554_v50, 0.0  ;;  %v549_v54 = vadd.f32 %v548_v51, %v453_v40 }
 0x320   :  { %vm576_vm15 = vcmp.gt.f32.partialorder %v554_v50, 0.0 }
 0x321   :  { %758 = vpow2.f32 %v561_v52  ;;  %v567_v55 = vmul.f32 1.442695, %v560_v53  ;;  %v559_v56 = vmin.f32 %v549_v54, 0.0  ;;  %vm575_vm1 = vcmp.gt.f32.partialorder %v549_v54, 0.0 }
 0x323   :  { %760 = vpow2.f32 %v567_v55  ;;  %v565_v57 = vmul.f32 1.442695, %v559_v56 }
 0x325   :  { %762 = vpow2.f32 %v565_v57 }
 0x32c   :  { %v757_v59 = vpop.eup %756 }
 0x32d   :  { %v670_v60 = vadd.f32 -1.0, %v757_v59 }
 0x32e   :  { %v759_v61 = vpop.eup %758 }
 0x32f   :  { %v669_v62 = vadd.f32 -1.0, %v759_v61  ;;  %v578_v1 = vsel %vm574_vm13, %v544_v42, %v670_v60 }
 0x330   :  { %v761_v63 = vpop.eup %760  ;;  %v606_v7 = vmul.f32 %v593_v58, %v578_v1 }
 0x331   :  { %v577_v3 = vsel %vm573_vm14, %v539_v45, %v669_v62  ;;  %v672_v4 = vadd.f32 -1.0, %v761_v63 }
 0x332   :  { %v605_v5 = vmul.f32 %v588_v2, %v577_v3  ;;  %v763_v6 = vpop.eup %762  ;;  %v611_v13 = vsel %vm609_vm0, %v606_v7, 0.0 }
 0x333   :  { %v580_v8 = vsel %vm576_vm15, %v554_v50, %v672_v4  ;;  %v671_v9 = vadd.f32 -1.0, %v763_v6 }
 0x334   :  { %v610_v10 = vsel %vm609_vm0, %v605_v5, 0.0  ;;  %v608_v14 = vmul.f32 %v603_v11, %v580_v8 }
 0x335   :  { %v579_v12 = vsel %vm575_vm1, %v549_v54, %v671_v9  ;;  %v612_v16 = vadd.f32 %v611_v13, %v610_v10 }
 0x336   :  { %v607_v15 = vmul.f32 %v598_v0, %v579_v12  ;;  %v615_v19 = vsel %vm609_vm0, %v608_v14, 0.0 }
 0x338   :  { %v613_v17 = vsel %vm609_vm0, %v607_v15, 0.0 }
 0x339   :  { %v614_v18 = vadd.f32 %v613_v17, %v612_v16 }
 0x33b   :  { %v616_v21 = vadd.f32 %v615_v19, %v614_v18 }
 0x33d   :  { %v617_v22 = vrot.slane %v616_v21, 4 }
 0x33f   :  { %v618_v24 = vadd.f32 %v617_v22, %v616_v21 }
 0x341   :  { %v619_v25 = vrot.slane %v618_v24, 2 }
 0x343   :  { %v620_v27 = vadd.f32 %v619_v25, %v618_v24 }
 0x345   :  { %v621_v29 = vrot.slane %v620_v27, 1 }
 0x347   :  { %v622_v31 = vadd.f32 %v621_v29, %v620_v27 }
 0x349   :  { %v633_v32 = vadd.f32 %v632_v30, %v622_v31 }
 0x34b   :  { %635 = vst.msk [vmem:[#allocation3] sm:$0x1] %vm634_vm2, %v633_v32 }
 0x34c   :  { %775 = shalt.err (!%p772_p4)
}
 0x34d   :  { %645 = dma.vmem_to_hbm [thread:$0]  %s643_s23, 16, %s962_s11, [#allocation4]  }
 0x34e   :  { %784 = dma.done.wait [#allocation4], 16  }
 0x34f   :  { %785 = vsyncadd [#allocation4], 4294967280 }
 0x350   :  { %649 = vsyncpa [#allocation4], 1 }

</bundles_post_ra>
